<compile_context>
chip_gen: v7x
topology: tpu7x:2x2x1
jax: 0.10.0
libtpu: 0.0.40
codegen_flags: <defaults>
</compile_context>

<pallas_src>
import jax
import jax.numpy as jnp
from jax.experimental import pallas as pl
from jax.experimental.pallas import tpu as pltpu


# ----------------------------------------------------------------------------
# Pooling metadata (mirrors the PyTorch align() arithmetic exactly).
# ----------------------------------------------------------------------------
def _pool_meta(s_raw: int, dst_len: int):
    """Return (pool_size, r) where r = #valid timesteps in the last pool group."""
    if s_raw % dst_len == 0:
        pool = s_raw // dst_len
    else:
        pool = s_raw // dst_len + 1
    r = s_raw - (pool - 1) * dst_len          # 1 <= r <= dst_len
    return pool, r


# ----------------------------------------------------------------------------
# Fused kernel: one body pools every modality that needs alignment.
# ----------------------------------------------------------------------------
def _make_fused_kernel(dst_len: int, seq_lens):
    n = len(seq_lens)

    def kernel(*refs):
        in_refs, out_refs = refs[:n], refs[n:]
        L = dst_len
        for x_ref, o_ref, s_raw in zip(in_refs, out_refs, seq_lens):
            pool, r = _pool_meta(s_raw, L)
            inv_p = jnp.float32(1.0 / pool)

            # Full pool groups: unrolled add chain over ref slices.  Stays on
            # the VALU (no cross-sublane XLU reduce) and never materializes the
            # whole input as one big f32 value.
            acc = None
            for p in range(pool - 1):
                grp = x_ref[:, p * L:(p + 1) * L, :].astype(jnp.float32)
                acc = grp if acc is None else acc + grp

            if r == L:
                # Last group is full: no replicate-pad needed at all.
                last = x_ref[:, (pool - 1) * L:pool * L, :].astype(jnp.float32)
                total = last if acc is None else acc + last
                o_ref[...] = (total * inv_p).astype(o_ref.dtype)
            else:
                # Last group is partial: the PyTorch pad rows are all equal to
                # the last raw timestep, so add them as an in-kernel correction
                # instead of materializing a padded copy in HBM.
                valid = x_ref[:, (pool - 1) * L:s_raw, :].astype(jnp.float32)
                pad_row = x_ref[:, s_raw - 1:s_raw, :].astype(jnp.float32)
                pad_blk = jnp.broadcast_to(
                    pad_row, (pad_row.shape[0], L - r, pad_row.shape[2]))
                if acc is None:                 # pool == 1 (s_raw < dst_len)
                    head = valid
                    tail = pad_blk
                else:
                    head = acc[:, :r, :] + valid
                    tail = acc[:, r:, :] + pad_blk
                o_ref[:, :r, :] = (head * inv_p).astype(o_ref.dtype)
                o_ref[:, r:, :] = (tail * inv_p).astype(o_ref.dtype)

    return kernel


# ----------------------------------------------------------------------------
# pallas_call wrapper.
# ----------------------------------------------------------------------------
_VMEM_SOFT_BUDGET = 8 * 1024 * 1024        # stay well under 16/32 MiB scoped defaults


def _vmem_limit(nbytes: int) -> int:
    # 2x headroom for f32 temporaries / compiler scratch, clamped to v7x's 64 MiB.
    return int(min(max(2 * nbytes, 16 * 1024 * 1024), 64 * 1024 * 1024))


def _choose_batch_block(batch: int, bytes_per_row: int):
    """None -> whole-array no-grid call; otherwise a batch block size."""
    if batch * bytes_per_row * 3 <= _VMEM_SOFT_BUDGET:
        return None
    for bb in range(min(batch, 1024), 7, -1):
        if batch % bb == 0 and bb % 8 == 0 and bb * bytes_per_row * 3 <= _VMEM_SOFT_BUDGET:
            return bb
    return None   # no clean divisor: fall back to whole-array operands


def _fused_avg_pool(xs_raw, dst_len: int):
    """One pallas_call pooling every raw (B, S_i, D_i) modality to (B, dst_len, D_i)."""
    batch = xs_raw[0].shape[0]
    seq_lens = tuple(x.shape[1] for x in xs_raw)
    kernel = _make_fused_kernel(dst_len, seq_lens)

    out_shape = tuple(
        jax.ShapeDtypeStruct((batch, dst_len, x.shape[2]), x.dtype) for x in xs_raw)

    in_bytes = sum(x.size * x.dtype.itemsize for x in xs_raw)
    out_bytes = sum(batch * dst_len * x.shape[2] * x.dtype.itemsize for x in xs_raw)
    cost = pl.CostEstimate(flops=sum(x.size for x in xs_raw),
                           transcendentals=0,
                           bytes_accessed=in_bytes + out_bytes)

    bytes_per_row = max((in_bytes + out_bytes) // batch, 1)
    bb = _choose_batch_block(batch, bytes_per_row)

    if bb is None:
        # Whole problem fits comfortably in VMEM: no grid, no pipeline, no
        # double-buffering -- operands land in VMEM once and the kernel runs.
        return pl.pallas_call(
            kernel,
            out_shape=out_shape,
            in_specs=[pl.BlockSpec(memory_space=pltpu.MemorySpace.VMEM)
                      for _ in xs_raw],
            out_specs=tuple(pl.BlockSpec(memory_space=pltpu.MemorySpace.VMEM)
                            for _ in xs_raw),
            compiler_params=pltpu.CompilerParams(
                vmem_limit_bytes=_vmem_limit(batch * bytes_per_row)),
            cost_estimate=cost,
        )(*xs_raw)

    # Large inputs: tile over batch and mark the axis "parallel" so Mosaic can
    # shard the grid across both v7x TensorCores (no harm on v5e/v6e).
    grid = (batch // bb,)
    in_specs = [pl.BlockSpec((bb, x.shape[1], x.shape[2]), lambda i: (i, 0, 0))
                for x in xs_raw]
    out_specs = tuple(pl.BlockSpec((bb, dst_len, x.shape[2]), lambda i: (i, 0, 0))
                      for x in xs_raw)
    return pl.pallas_call(
        kernel,
        out_shape=out_shape,
        grid=grid,
        in_specs=in_specs,
        out_specs=out_specs,
        compiler_params=pltpu.CompilerParams(
            dimension_semantics=("parallel",),
            vmem_limit_bytes=_vmem_limit(2 * bb * bytes_per_row)),   # 2x: dbl buffers
        cost_estimate=cost,
    )(*xs_raw)


# ----------------------------------------------------------------------------
# Forward-pass wrappers.
# ----------------------------------------------------------------------------
@jax.jit
def _align_pallas(text_x, audio_x, video_x):
    dst_len = text_x.shape[1]
    xs = (text_x, audio_x, video_x)
    needs = tuple(x.shape[1] != dst_len for x in xs)
    pooled = list(_fused_avg_pool([x for x, nd in zip(xs, needs) if nd], dst_len))
    return tuple(pooled.pop(0) if nd else x for x, nd in zip(xs, needs))


def _align_one_xla(x, dst_len: int):
    b, s_raw, d = x.shape
    if s_raw == dst_len:
        return x
    pool, _ = _pool_meta(s_raw, dst_len)
    pad_len = pool * dst_len - s_raw
    if pad_len:
        pad = jnp.broadcast_to(x[:, -1:, :], (b, pad_len, d))
        x = jnp.concatenate([x, pad], axis=1)
    return x.reshape(b, pool, dst_len, d).mean(axis=1)


@jax.jit
def _align_xla(text_x, audio_x, video_x):
    dst_len = text_x.shape[1]
    return tuple(_align_one_xla(x, dst_len) for x in (text_x, audio_x, video_x))


_PALLAS_MIN_BYTES = 1 << 20   # below ~1 MiB the custom-call boundary dominates


def align_subnet_forward(text_x, audio_x, video_x, *, use_pallas=None):
    """Forward pass of AlignSubNet(mode='avg_pool'); dst_len = text_x.shape[1]."""
    if text_x.shape[1] == audio_x.shape[1] == video_x.shape[1]:
        return text_x, audio_x, video_x      # pass-through (PyTorch semantics)
    if use_pallas is None:
        total_bytes = sum(x.size * x.dtype.itemsize
                          for x in (text_x, audio_x, video_x))
        use_pallas = total_bytes >= _PALLAS_MIN_BYTES
    impl = _align_pallas if use_pallas else _align_xla
    return impl(text_x, audio_x, video_x)


# ----------------------------------------------------------------------------
# Demo / self-test.
# ----------------------------------------------------------------------------
if __name__ == "__main__":
    key = jax.random.PRNGKey(0)
    k_t, k_a, k_v = jax.random.split(key, 3)

    # args.seq_lens = (8, 33, 16); args.feature_dims = (32, 16, 24); batch = 2
    B = 2
    seq_len_t, seq_len_a, seq_len_v = 8, 33, 16
    dim_t, dim_a, dim_v = 32, 16, 24

    text_x = jax.random.normal(k_t, (B, seq_len_t, dim_t), dtype=jnp.float32)
    audio_x = jax.random.normal(k_a, (B, seq_len_a, dim_a), dtype=jnp.float32)
    video_x = jax.random.normal(k_v, (B, seq_len_v, dim_v), dtype=jnp.float32)

    # Force the Pallas path (the size heuristic would pick XLA at toy sizes).
    out_t, out_a, out_v = align_subnet_forward(text_x, audio_x, video_x,
                                               use_pallas=True)
    jax.block_until_ready((out_t, out_a, out_v))

    # Correctness vs a pure-JAX mirror of the PyTorch __avg_pool semantics.
    ref_t, ref_a, ref_v = _align_xla(text_x, audio_x, video_x)
    dst_len = seq_len_t
    assert out_t.shape == (B, dst_len, dim_t)
    assert out_a.shape == (B, dst_len, dim_a)
    assert out_v.shape == (B, dst_len, dim_v)
    assert jnp.allclose(out_t, ref_t, atol=1e-5)
    assert jnp.allclose(out_a, ref_a, atol=1e-5)
    assert jnp.allclose(out_v, ref_v, atol=1e-5)

    print("KERNEL_OK")
</pallas_src>

<mosaic_0001>
module attributes {stable_mosaic.version = 11 : i64} {
  func.func @kernel(%arg0: memref<2x33x16xf32, #tpu.memory_space<vmem>>, %arg1: memref<2x16x24xf32, #tpu.memory_space<vmem>>, %arg2: memref<2x8x16xf32, #tpu.memory_space<vmem>>, %arg3: memref<2x8x24xf32, #tpu.memory_space<vmem>>) attributes {dimension_semantics = [], scalar_prefetch = 0 : i64, scratch_operands = 0 : i64, tpu.core_type = #tpu.core_type<tc>} {
    %c0 = arith.constant 0 : index
    %c0_0 = arith.constant 0 : index
    %c0_1 = arith.constant 0 : index
    %0 = vector.load %arg0[%c0, %c0_0, %c0_1] : memref<2x33x16xf32, #tpu.memory_space<vmem>>, vector<2x8x16xf32>
    %c0_2 = arith.constant 0 : index
    %c8 = arith.constant 8 : index
    %c0_3 = arith.constant 0 : index
    %1 = vector.load %arg0[%c0_2, %c8, %c0_3] : memref<2x33x16xf32, #tpu.memory_space<vmem>>, vector<2x8x16xf32>
    %2 = arith.addf %0, %1 : vector<2x8x16xf32>
    %c0_4 = arith.constant 0 : index
    %c16 = arith.constant 16 : index
    %c0_5 = arith.constant 0 : index
    %3 = vector.load %arg0[%c0_4, %c16, %c0_5] : memref<2x33x16xf32, #tpu.memory_space<vmem>>, vector<2x8x16xf32>
    %4 = arith.addf %2, %3 : vector<2x8x16xf32>
    %c0_6 = arith.constant 0 : index
    %c24 = arith.constant 24 : index
    %c0_7 = arith.constant 0 : index
    %5 = vector.load %arg0[%c0_6, %c24, %c0_7] : memref<2x33x16xf32, #tpu.memory_space<vmem>>, vector<2x8x16xf32>
    %6 = arith.addf %4, %5 : vector<2x8x16xf32>
    %c0_8 = arith.constant 0 : index
    %c32 = arith.constant 32 : index
    %c0_9 = arith.constant 0 : index
    %7 = vector.load %arg0[%c0_8, %c32, %c0_9] : memref<2x33x16xf32, #tpu.memory_space<vmem>>, vector<2x1x16xf32>
    %c0_10 = arith.constant 0 : index
    %c32_11 = arith.constant 32 : index
    %c0_12 = arith.constant 0 : index
    %8 = vector.load %arg0[%c0_10, %c32_11, %c0_12] : memref<2x33x16xf32, #tpu.memory_space<vmem>>, vector<2x1x16xf32>
    %9 = vector.shape_cast %8 : vector<2x1x16xf32> to vector<2x1x16xf32>
    %10 = vector.broadcast %9 : vector<2x1x16xf32> to vector<2x7x16xf32>
    %11 = vector.extract_strided_slice %6 {offsets = [0, 0, 0], sizes = [2, 1, 16], strides = [1, 1, 1]} : vector<2x8x16xf32> to vector<2x1x16xf32>
    %12 = arith.addf %11, %7 : vector<2x1x16xf32>
    %13 = vector.extract_strided_slice %6 {offsets = [0, 1, 0], sizes = [2, 7, 16], strides = [1, 1, 1]} : vector<2x8x16xf32> to vector<2x7x16xf32>
    %14 = arith.addf %13, %10 : vector<2x7x16xf32>
    %cst = arith.constant 2.000000e-01 : f32
    %15 = vector.broadcast %cst : f32 to vector<2x1x16xf32>
    %16 = arith.mulf %12, %15 : vector<2x1x16xf32>
    %c0_13 = arith.constant 0 : index
    %c0_14 = arith.constant 0 : index
    %c0_15 = arith.constant 0 : index
    %17 = vector.load %arg2[%c0_13, %c0_14, %c0_15] : memref<2x8x16xf32, #tpu.memory_space<vmem>>, vector<2x1x16xf32>
    tpu.vector_store %arg2[%c0_13, %c0_14, %c0_15], %16 {strides = array<i32>} : memref<2x8x16xf32, #tpu.memory_space<vmem>>, vector<2x1x16xf32>,
    %cst_16 = arith.constant 2.000000e-01 : f32
    %18 = vector.broadcast %cst_16 : f32 to vector<2x7x16xf32>
    %19 = arith.mulf %14, %18 : vector<2x7x16xf32>
    %c0_17 = arith.constant 0 : index
    %c1 = arith.constant 1 : index
    %c0_18 = arith.constant 0 : index
    %20 = vector.load %arg2[%c0_17, %c1, %c0_18] : memref<2x8x16xf32, #tpu.memory_space<vmem>>, vector<2x7x16xf32>
    tpu.vector_store %arg2[%c0_17, %c1, %c0_18], %19 {strides = array<i32>} : memref<2x8x16xf32, #tpu.memory_space<vmem>>, vector<2x7x16xf32>,
    %c0_19 = arith.constant 0 : index
    %c0_20 = arith.constant 0 : index
    %c0_21 = arith.constant 0 : index
    %21 = vector.load %arg1[%c0_19, %c0_20, %c0_21] : memref<2x16x24xf32, #tpu.memory_space<vmem>>, vector<2x8x24xf32>
    %c0_22 = arith.constant 0 : index
    %c8_23 = arith.constant 8 : index
    %c0_24 = arith.constant 0 : index
    %22 = vector.load %arg1[%c0_22, %c8_23, %c0_24] : memref<2x16x24xf32, #tpu.memory_space<vmem>>, vector<2x8x24xf32>
    %23 = arith.addf %21, %22 : vector<2x8x24xf32>
    %cst_25 = arith.constant 5.000000e-01 : f32
    %24 = vector.broadcast %cst_25 : f32 to vector<2x8x24xf32>
    %25 = arith.mulf %23, %24 : vector<2x8x24xf32>
    %c0_26 = arith.constant 0 : index
    %c0_27 = arith.constant 0 : index
    %c0_28 = arith.constant 0 : index
    %26 = vector.load %arg3[%c0_26, %c0_27, %c0_28] : memref<2x8x24xf32, #tpu.memory_space<vmem>>, vector<2x8x24xf32>
    tpu.vector_store %arg3[%c0_26, %c0_27, %c0_28], %25 {strides = array<i32>} : memref<2x8x24xf32, #tpu.memory_space<vmem>>, vector<2x8x24xf32>,
    return
  }
}

</mosaic_0001>

<bundles_post_ra>
// kernel: _align_pallas.1
= control target key start
LH: loop header
LB: loop body
LE: loop exit
PB: predicated region body
PF: predicated region fallthrough
CT: control target
= control target key end

     0   :  { %9 = vsyncpa [#allocation3], 0  ;;  %v31_v3 = vlaneseq  ;;  %s251_s0 = inlined_call_operand.vmem [shape: f32[2,33,16], index: 0, kind: input, shape index: {}]   ;;  %s252_s1 = inlined_call_operand.vmem [shape: f32[2,16,24], index: 1, kind: input, shape index: {}]   ;;  %s253_s2 = inlined_call_operand.hbm [shape: f32[2,8,16], index: 2, kind: output, shape index: {0}]   ;;  %s254_s3 = inlined_call_operand.hbm [shape: f32[2,8,24], index: 3, kind: output, shape index: {1}]  }
   0x1   :  { %v15_v0 = vld [vmem:[%s251_s0] sm:$0xff]  ;;  %v17_v1 = vld [vmem:[%s251_s0 + $0x8] sm:$0xff]  ;;  %v21_v2 = vld [vmem:[%s251_s0 + $0x10] sm:$0xff] }
   0x2   :  { %v19_v4 = vadd.f32 %v17_v1, %v15_v0  ;;  %v25_v5 = vld [vmem:[%s251_s0 + $0x18] sm:$0xff]  ;;  %v29_v6 = vld [vmem:[%s251_s0 + $0x20] sm:$0x1]  ;;  %v16_v7 = vld [vmem:[%s251_s0 + $0x28] sm:$0xff]  ;;  %v32_v11 = vshrl.u32 %v31_v3, 7 }
   0x3   :  { %v18_v8 = vld [vmem:[%s251_s0 + $0x30] sm:$0xff]  ;;  %v22_v9 = vld [vmem:[%s251_s0 + $0x38] sm:$0xff]  ;;  %v26_v10 = vld [vmem:[%s251_s0 + $0x40] sm:$0xff] }
   0x4   :  { %v23_v12 = vadd.f32 %v21_v2, %v19_v4  ;;  %v20_v13 = vadd.f32 %v18_v8, %v16_v7  ;;  %v30_v14 = vld [vmem:[%s251_s0 + $0x48] sm:$0x1]  ;;  %v53_v15 = vld [vmem:[%s252_s1] sm:$0xff]  ;;  %v33_v17 = vsub.s32 0, %v32_v11  ;;  %v54_v19 = vld [vmem:[%s252_s1 + $0x10] sm:$0xff] }
   0x5   :  { %v55_v16 = vld [vmem:[%s252_s1 + $0x8] sm:$0xff]  ;;  %v56_v20 = vld [vmem:[%s252_s1 + $0x18] sm:$0xff] }
   0x6   :  { %v57_v18 = vadd.f32 %v55_v16, %v53_v15 }
   0x7   :  { %10 = vsyncpa [#allocation5], 0  ;;  %s148_s0 = smov [#allocation4]   ;;  %v27_v21 = vadd.f32 %v25_v5, %v23_v12  ;;  %v24_v22 = vadd.f32 %v22_v9, %v20_v13  ;;  %vm61_vm0 = vcmask 195584   ;;  %v58_v23 = vadd.f32 %v56_v20, %v54_v19  ;;  %s149_s1 = smov [#allocation2]  }
   0x8   :  { %s81_s13 = sshll.u32 %s148_s0, 4  ;;  %v34_v24 = vrot.slane %v29_v6, %v33_v17  ;;  %v38_v25 = vrot.slane %v30_v14, %v33_v17  ;;  %v59_v26 = vmul.f32 0.5, %v57_v18  ;;  %vm45_vm1 = vcmask 122880   ;;  %s69_s14 = sshll.u32 %s149_s1, 4  ;;  %s214_s13 = int_to_ptr.vmem [resolvable:$true] %s81_s13  ;;  %s70_s14 = int_to_ptr.vmem [resolvable:$true] %s69_s14 }
   0x9   :  { %v39_v27 = vadd.f32 %v29_v6, %v27_v21  ;;  %v28_v28 = vadd.f32 %v26_v10, %v24_v22  ;;  %v60_v29 = vmul.f32 0.5, %v58_v23  ;;  %vm50_vm2 = vcmask 130049   ;;  %s100_s15 = scalar_lea.vmem %s214_s13, 256  ;;  %p105_p1 = scmp.lt.s32.totalorder %s214_s13, %s214_s13 }
   0xa   :  { %v41_v30 = vadd.f32 %v34_v24, %v27_v21  ;;  %62 = vst.msk [vmem:[#allocation4] sm:$0xff] %vm61_vm0, %v59_v26  ;;  %p101_p0 = scmp.ne.s32.totalorder %s214_s13, %s100_s15  ;;  %p106_p2 = scmp.lt.s32.totalorder %s100_s15, %s100_s15 }
   0xb   :  { %v43_v31 = vmul.f32 0.2, %v39_v27  ;;  %v40_v32 = vadd.f32 %v30_v14, %v28_v28  ;;  %v42_v33 = vadd.f32 %v38_v25, %v28_v28  ;;  %63 = vst.msk [vmem:[#allocation4 + $0x8] sm:$0xff] %vm61_vm0, %v60_v29 }
   0xc   :  { %v48_v34 = vmul.f32 0.2, %v41_v30  ;;  %p107_p3 = por %p106_p2, %p105_p1 }
   0xe   :  { %p108_p4 = pnand %p107_p3, %p101_p0 }
  0x10   :  { %111 = shalt.err (!%p108_p4)
}
  0x11   :  { %s112_s18 = scalar_lea.hbm %s254_s3, 256 }
  0x12   :  { %p113_p5 = scmp.ne.s32.totalorder %s254_s3, %s112_s18  ;;  %p116_p6 = scmp.lt.u32.totalorder %s112_s18, %s254_s3 }
  0x14   :  { %p118_p7 = pnand %p116_p6, %p113_p5 }
  0x16   :  { %121 = shalt.err (!%p118_p7)
}
  0x17   :  { %s150_s23 = smov 128   ;;  %s151_s24 = smov 8   ;;  %46 = vst.msk [vmem:[#allocation2] sm:$0x1] %vm45_vm1, %v43_v31  ;;  %v44_v35 = vmul.f32 0.2, %v40_v32 }
  0x18   :  { %87 = dma.vmem_to_hbm [thread:$0]  %s214_s13, 256, %s254_s3, [#allocation5], %s150_s23, %s150_s23, %s151_s24   ;;  %v49_v36 = vmul.f32 0.2, %v42_v33  ;;  %51 = vst.msk [vmem:[#allocation2] sm:$0xfe] %vm50_vm2, %v48_v34 }
  0x19   :  { %47 = vst.msk [vmem:[#allocation2 + $0x8] sm:$0x1] %vm45_vm1, %v44_v35  ;;  %s122_s27 = scalar_lea.vmem %s70_s14, 256  ;;  %p127_p9 = scmp.lt.s32.totalorder %s70_s14, %s70_s14 }
  0x1a   :  { %52 = vst.msk [vmem:[#allocation2 + $0x8] sm:$0xfe] %vm50_vm2, %v49_v36  ;;  %p123_p8 = scmp.ne.s32.totalorder %s70_s14, %s122_s27  ;;  %p128_p10 = scmp.lt.s32.totalorder %s122_s27, %s122_s27 }
  0x1c   :  { %p129_p11 = por %p128_p10, %p127_p9 }
  0x1e   :  { %p130_p12 = pnand %p129_p11, %p123_p8 }
  0x20   :  { %133 = shalt.err (!%p130_p12)
}
  0x21   :  { %s134_s29 = scalar_lea.hbm %s253_s2, 256 }
  0x22   :  { %p135_p13 = scmp.ne.s32.totalorder %s253_s2, %s134_s29  ;;  %p138_p0 = scmp.lt.u32.totalorder %s134_s29, %s253_s2 }
  0x24   :  { %p140_p1 = pnand %p138_p0, %p135_p13 }
  0x26   :  { %143 = shalt.err (!%p140_p1)
}
  0x27   :  { %75 = dma.vmem_to_hbm [thread:$0]  %s70_s14, 256, %s253_s2, [#allocation3], %s150_s23, %s150_s23, %s151_s24  }
  0x28   :  { %144 = dma.done.wait [#allocation3], 256  }
  0x29   :  { %145 = vsyncadd [#allocation3], 4294967040 }
  0x2a   :  { %146 = dma.done.wait [#allocation5], 256  }
  0x2b   :  { %147 = vsyncadd [#allocation5], 4294967040 }
  0x2c   :  { %94 = vsyncpa [#allocation3], 1 }
  0x2d   :  { %95 = vsyncpa [#allocation5], 1 }

</bundles_post_ra>
